<compile_context>
chip_gen: v7x
topology: tpu7x:2x2x1
jax: 0.10.0
libtpu: 0.0.40
codegen_flags: <defaults>
</compile_context>

<pallas_src>
import functools
import math

import jax
import jax.numpy as jnp
from jax.experimental import pallas as pl
from jax.experimental.pallas import tpu as pltpu


def _round_up(x, m):
    return (x + m - 1) // m * m


def _vmem_capacity_bytes():
    try:
        return int(pltpu.get_tpu_info().vmem_capacity_bytes)
    except Exception:
        return 64 * 1024 * 1024        # conservative fallback (v7x per-TC)


def _largest_div_tile(total, unit, target):
    """Largest multiple of `unit` that divides `total` and is <= target."""
    n = total // unit
    best = unit
    for k in range(1, n + 1):
        if n % k == 0 and k * unit <= target:
            best = k * unit
    return best


def _vmem_estimate(tile_rows, tile_ff, d_model_p, d_ff_p, out_itemsize,
                   out_is_f32):
    """Rough VMEM footprint (bytes) of one kernel configuration."""
    grid_ff = d_ff_p // tile_ff
    n_w_buf = 1 if grid_ff == 1 else 2                    # single vs double buffer
    w_bytes = n_w_buf * 2 * (d_model_p * tile_ff * 2)     # W1 + W2 bf16 tiles
    b_bytes = n_w_buf * tile_ff * 4 + d_model_p * 4       # b1 + b2 (f32)
    x_bytes = 2 * tile_rows * d_model_p * 2               # bf16, double-buffered
    o_bytes = 2 * tile_rows * d_model_p * out_itemsize    # double-buffered
    acc_bytes = 0 if (grid_ff == 1 or out_is_f32) else tile_rows * d_model_p * 4
    h_bytes = tile_rows * tile_ff * 6                     # f32 h + bf16 copy
    return w_bytes + b_bytes + x_bytes + o_bytes + acc_bytes + h_bytes


def _choose_tiles(rows, d_model_p, d_ff_p, out_itemsize, out_is_f32,
                  vmem_budget):
    rows_p8 = max(8, _round_up(rows, 8))
    row_cands = (1024, 512, 256, 128, 64, 32, 16, 8)

    def adj_rows(tr):
        tr = min(tr, rows_p8)
        # Megacore (v7x): keep >= 2 row tiles when there is enough work.
        if rows_p8 > 8 and rows_p8 // tr < 2:
            tr = max(8, _round_up(-(-rows_p8 // 2), 8))
        return tr

    # 1) Weight-resident path: tile_ff == d_ff_p, W1/W2 DMA'd exactly once.
    for tr in row_cands:
        tr = adj_rows(tr)
        if _vmem_estimate(tr, d_ff_p, d_model_p, d_ff_p, out_itemsize,
                          out_is_f32) <= vmem_budget:
            return tr, d_ff_p

    # 2) Streaming path: weights re-fetched per row tile -> favor big row tiles.
    for tf_target in (512, 256, 128):
        tf = _largest_div_tile(d_ff_p, 128, tf_target)
        for tr in row_cands:
            tr = adj_rows(tr)
            if _vmem_estimate(tr, tf, d_model_p, d_ff_p, out_itemsize,
                              out_is_f32) <= vmem_budget:
                return tr, tf

    # 3) Last resort (gigantic d_model): smallest sane config.
    return adj_rows(128), _largest_div_tile(d_ff_p, 128, 256)


def ffn_kernel(x_ref, w1_ref, b1_ref, w2_ref, b2_ref, seed_ref, o_ref, *scratch,
               dropout_p, training, n_ff_tiles):
    # --- linear_1 (bf16 MXU operands, f32 accumulation) + ReLU ---
    h = jnp.dot(x_ref[...], w1_ref[...], preferred_element_type=jnp.float32)
    h = h + b1_ref[...]
    h = jnp.maximum(h, 0.0)

    # --- dropout (training only; eval == identity, like nn.Dropout) ---
    # TODO(synk): training-mode dropout uses the TPU hardware PRNG, so the mask
    # does not bit-match torch's RNG stream (inverted-dropout semantics match).
    if training and dropout_p > 0.0:
        if dropout_p >= 1.0:
            h = jnp.zeros_like(h)
        else:
            pltpu.prng_seed(seed_ref[0], pl.program_id(0), pl.program_id(1))
            bits = pltpu.bitcast(pltpu.prng_random_bits(h.shape), jnp.uint32)
            threshold = jnp.uint32(min(int(dropout_p * 4294967296.0),
                                       4294967295))
            keep = bits >= threshold
            h = jnp.where(keep, h * (1.0 / (1.0 - dropout_p)), 0.0)

    # --- linear_2 partial product ---
    partial = jnp.dot(h.astype(jnp.bfloat16), w2_ref[...],
                      preferred_element_type=jnp.float32)

    if n_ff_tiles == 1:
        # Weight-resident path: single shot, no accumulator needed.
        o_ref[...] = (partial + b2_ref[...]).astype(o_ref.dtype)
    else:
        j = pl.program_id(1)
        # f32 outputs accumulate directly into the resident output block;
        # other dtypes use the f32 VMEM scratch.
        acc_ref = scratch[0] if scratch else o_ref

        @pl.when(j == 0)
        def _():
            acc_ref[...] = jnp.zeros_like(acc_ref)

        acc_ref[...] += partial

        @pl.when(j == n_ff_tiles - 1)
        def _():
            o_ref[...] = (acc_ref[...] + b2_ref[...]).astype(o_ref.dtype)


def feed_forward_block(x, w1, b1, w2, b2, *, dropout_p=0.1, training=False,
                       seed=0, tile_rows=None, tile_ff=None):
    """x: (..., d_model); w1: (d_model, d_ff); b1: (d_ff,);
    w2: (d_ff, d_model); b2: (d_model,)."""
    orig_shape = x.shape
    d_model = orig_shape[-1]
    d_ff = w1.shape[1]
    out_dtype = x.dtype
    out_itemsize = jnp.dtype(out_dtype).itemsize
    out_is_f32 = (out_dtype == jnp.float32)

    # Cast activations to bf16 ONCE (halves x DMA bytes and VMEM footprint;
    # removes per-grid-step casts from the kernel).
    x2 = x.reshape(-1, d_model).astype(jnp.bfloat16)
    rows = x2.shape[0]

    d_model_p = _round_up(d_model, 128)      # lane-dense output, full MXU K/N
    d_ff_p = _round_up(d_ff, 128)            # only 128-align; tile divides this

    vmem_cap = _vmem_capacity_bytes()
    vmem_budget = (vmem_cap * 3) // 4        # ~48 MiB v7x, ~96 MiB v5e/v6e

    auto_tr, auto_tf = _choose_tiles(rows, d_model_p, d_ff_p, out_itemsize,
                                     out_is_f32, vmem_budget)
    if tile_rows is None:
        tile_rows = auto_tr
    tile_rows = max(8, _round_up(min(tile_rows, _round_up(rows, 8)), 8))
    if tile_ff is None:
        tile_ff = auto_tf
    tile_ff = min(_round_up(tile_ff, 128), d_ff_p)
    if d_ff_p % tile_ff != 0:
        tile_ff = _largest_div_tile(d_ff_p, 128, tile_ff)

    rows_p = _round_up(rows, tile_rows)
    grid_rows = rows_p // tile_rows
    n_ff_tiles = d_ff_p // tile_ff
    resident = (n_ff_tiles == 1)

    # --- zero padding (padded rows/cols contribute exactly zero and the
    #     padded output region is sliced off) ---
    if rows_p != rows or d_model_p != d_model:
        x2 = jnp.pad(x2, ((0, rows_p - rows), (0, d_model_p - d_model)))
    w1_bf = w1.astype(jnp.bfloat16)
    w2_bf = w2.astype(jnp.bfloat16)
    if d_model_p != d_model or d_ff_p != d_ff:
        w1_bf = jnp.pad(w1_bf, ((0, d_model_p - d_model), (0, d_ff_p - d_ff)))
        w2_bf = jnp.pad(w2_bf, ((0, d_ff_p - d_ff), (0, d_model_p - d_model)))
    b1_f = b1.astype(jnp.float32)
    if d_ff_p != d_ff:
        b1_f = jnp.pad(b1_f, (0, d_ff_p - d_ff))
    b1_2d = b1_f.reshape(1, d_ff_p)
    b2_f = b2.astype(jnp.float32)
    if d_model_p != d_model:
        b2_f = jnp.pad(b2_f, (0, d_model_p - d_model))
    b2_2d = b2_f.reshape(1, d_model_p)
    seed_arr = jnp.array([seed], jnp.int32)

    # Extra pipeline depth for streamed weights if there is VMEM headroom
    # (hides HBM DMA jitter, mainly helps v5e).
    weight_bufs = 2
    if not resident:
        est = _vmem_estimate(tile_rows, tile_ff, d_model_p, d_ff_p,
                             out_itemsize, out_is_f32)
        extra = 2 * d_model_p * tile_ff * 2
        if est + extra <= vmem_budget:
            weight_bufs = 3

    def _wspec(shape, index_map):
        if resident:
            return pl.BlockSpec(shape, index_map, pipeline_mode=pl.Buffered(1))
        if weight_bufs != 2:
            return pl.BlockSpec(shape, index_map,
                                pipeline_mode=pl.Buffered(weight_bufs))
        return pl.BlockSpec(shape, index_map)

    in_specs = [
        pl.BlockSpec((tile_rows, d_model_p), lambda i, j: (i, 0)),          # x
        _wspec((d_model_p, tile_ff), lambda i, j: (0, j)),                   # W1
        _wspec((1, tile_ff), lambda i, j: (0, j)),                           # b1
        _wspec((tile_ff, d_model_p), lambda i, j: (j, 0)),                   # W2
        pl.BlockSpec((1, d_model_p), lambda i, j: (0, 0),
                     pipeline_mode=pl.Buffered(1)),                          # b2
        pl.BlockSpec(memory_space=pltpu.SMEM),                               # seed
    ]
    out_specs = pl.BlockSpec((tile_rows, d_model_p), lambda i, j: (i, 0))

    use_acc_scratch = (n_ff_tiles > 1) and (not out_is_f32)
    scratch_shapes = ([pltpu.VMEM((tile_rows, d_model_p), jnp.float32)]
                      if use_acc_scratch else [])

    # Cost estimate reflects actual HBM traffic: streamed weights are fetched
    # once per row tile.
    w_stream_bytes = (w1_bf.size + w2_bf.size) * 2
    weight_fetches = 1 if resident else grid_rows
    out_hbm_bytes = rows_p * d_model_p * out_itemsize
    cost = pl.CostEstimate(
        flops=4 * rows_p * d_ff_p * d_model_p,
        transcendentals=0,
        bytes_accessed=(x2.size * 2 + w_stream_bytes * weight_fetches
                        + b1_2d.size * 4 + b2_2d.size * 4 + out_hbm_bytes))

    kernel = functools.partial(ffn_kernel,
                               dropout_p=float(dropout_p),
                               training=bool(training),
                               n_ff_tiles=n_ff_tiles)

    out = pl.pallas_call(
        kernel,
        out_shape=jax.ShapeDtypeStruct((rows_p, d_model_p), out_dtype),
        grid=(grid_rows, n_ff_tiles),
        in_specs=in_specs,
        out_specs=out_specs,
        scratch_shapes=scratch_shapes,
        compiler_params=pltpu.CompilerParams(
            dimension_semantics=("parallel", "arbitrary"),
            vmem_limit_bytes=int(vmem_budget)),
        cost_estimate=cost,
    )(x2, w1_bf, b1_2d, w2_bf, b2_2d, seed_arr)

    return out[:rows, :d_model].reshape(orig_shape)


def reference(x, w1, b1, w2, b2):
    # Pure-JAX eval-mode reference with the same bf16-operand / f32-accumulate
    # matmul precision as the kernel.
    h = jnp.dot(x.astype(jnp.bfloat16), w1.astype(jnp.bfloat16),
                preferred_element_type=jnp.float32) + b1.astype(jnp.float32)
    h = jnp.maximum(h, 0.0)
    y = jnp.dot(h.astype(jnp.bfloat16), w2.astype(jnp.bfloat16),
                preferred_element_type=jnp.float32) + b2.astype(jnp.float32)
    return y.astype(x.dtype)


if __name__ == "__main__":
    B, S, D_MODEL, D_FF = 2, 8, 32, 64   # (batch, seq, d_model, d_ff) smoke test
    key = jax.random.PRNGKey(0)
    kx, k1, kb1, k2, kb2 = jax.random.split(key, 5)

    x = jax.random.normal(kx, (B, S, D_MODEL), dtype=jnp.float32)
    w1 = jax.random.normal(k1, (D_MODEL, D_FF), jnp.float32) / math.sqrt(D_MODEL)
    b1 = jax.random.normal(kb1, (D_FF,), jnp.float32) * 0.01
    w2 = jax.random.normal(k2, (D_FF, D_MODEL), jnp.float32) / math.sqrt(D_FF)
    b2 = jax.random.normal(kb2, (D_MODEL,), jnp.float32) * 0.01

    # Eval-mode forward (dropout disabled, matching nn.Dropout at inference).
    out = feed_forward_block(x, w1, b1, w2, b2,
                             dropout_p=0.1, training=False, seed=0)
    out = jax.block_until_ready(out)

    ref = reference(x, w1, b1, w2, b2)
    assert out.shape == (B, S, D_MODEL)
    max_err = float(jnp.max(jnp.abs(out - ref)))
    assert jnp.allclose(out, ref, atol=2e-2, rtol=2e-2), max_err
    print("KERNEL_OK")
</pallas_src>

<mosaic_0001>
module attributes {stable_mosaic.version = 11 : i64} {
  func.func @ffn_kernel(%arg0: i32, %arg1: i32, %arg2: memref<8x128xbf16, #tpu.memory_space<vmem>>, %arg3: memref<128x128xbf16, #tpu.memory_space<vmem>>, %arg4: memref<1x128xf32, #tpu.memory_space<vmem>>, %arg5: memref<128x128xbf16, #tpu.memory_space<vmem>>, %arg6: memref<1x128xf32, #tpu.memory_space<vmem>>, %arg7: memref<1xi32, #tpu.memory_space<smem>>, %arg8: memref<8x128xf32, #tpu.memory_space<vmem>>) attributes {dimension_semantics = [#tpu.dimension_semantics<parallel>, #tpu.dimension_semantics<arbitrary>], iteration_bounds = array<i64: 2, 1>, scalar_prefetch = 0 : i64, scratch_operands = 0 : i64, tpu.core_type = #tpu.core_type<tc>, window_params = [{transform_indices = @transform_0, window_bounds = array<i64: 8, 128>}, {pipeline_mode = #tpu.pipeline_mode<synchronous>, transform_indices = @transform_1, window_bounds = array<i64: 128, 128>}, {pipeline_mode = #tpu.pipeline_mode<synchronous>, transform_indices = @transform_2, window_bounds = array<i64: 1, 128>}, {pipeline_mode = #tpu.pipeline_mode<synchronous>, transform_indices = @transform_3, window_bounds = array<i64: 128, 128>}, {pipeline_mode = #tpu.pipeline_mode<synchronous>, transform_indices = @transform_4, window_bounds = array<i64: 1, 128>}, {transform_indices = @transform_5, window_bounds = array<i64: 1>}, {transform_indices = @transform_6, window_bounds = array<i64: 8, 128>}]} {
    %c0 = arith.constant 0 : index
    %c0_0 = arith.constant 0 : index
    %0 = vector.load %arg2[%c0, %c0_0] : memref<8x128xbf16, #tpu.memory_space<vmem>>, vector<8x128xbf16>
    %c0_1 = arith.constant 0 : index
    %c0_2 = arith.constant 0 : index
    %1 = vector.load %arg3[%c0_1, %c0_2] : memref<128x128xbf16, #tpu.memory_space<vmem>>, vector<128x128xbf16>
    %cst = arith.constant dense<0.000000e+00> : vector<8x128xf32>
    %2 = tpu.matmul %0, %1, %cst {dimension_numbers = #tpu.dot_dimension_numbers<[1], [0], [0], [1], [0, 0, 1, 1], [], []>} : vector<8x128xbf16>, vector<128x128xbf16>, vector<8x128xf32> -> vector<8x128xf32>
    %c0_3 = arith.constant 0 : index
    %c0_4 = arith.constant 0 : index
    %3 = vector.load %arg4[%c0_3, %c0_4] : memref<1x128xf32, #tpu.memory_space<vmem>>, vector<1x128xf32>
    %4 = vector.broadcast %3 : vector<1x128xf32> to vector<8x128xf32>
    %5 = arith.addf %2, %4 : vector<8x128xf32>
    %cst_5 = arith.constant 0.000000e+00 : f32
    %6 = vector.broadcast %cst_5 : f32 to vector<8x128xf32>
    %7 = arith.maximumf %5, %6 : vector<8x128xf32>
    %8 = arith.truncf %7 : vector<8x128xf32> to vector<8x128xbf16>
    %c0_6 = arith.constant 0 : index
    %c0_7 = arith.constant 0 : index
    %9 = vector.load %arg5[%c0_6, %c0_7] : memref<128x128xbf16, #tpu.memory_space<vmem>>, vector<128x128xbf16>
    %cst_8 = arith.constant dense<0.000000e+00> : vector<8x128xf32>
    %10 = tpu.matmul %8, %9, %cst_8 {dimension_numbers = #tpu.dot_dimension_numbers<[1], [0], [0], [1], [0, 0, 1, 1], [], []>} : vector<8x128xbf16>, vector<128x128xbf16>, vector<8x128xf32> -> vector<8x128xf32>
    %c0_9 = arith.constant 0 : index
    %c0_10 = arith.constant 0 : index
    %11 = vector.load %arg6[%c0_9, %c0_10] : memref<1x128xf32, #tpu.memory_space<vmem>>, vector<1x128xf32>
    %12 = vector.broadcast %11 : vector<1x128xf32> to vector<8x128xf32>
    %13 = arith.addf %10, %12 : vector<8x128xf32>
    %c0_11 = arith.constant 0 : index
    %c0_12 = arith.constant 0 : index
    %14 = vector.load %arg8[%c0_11, %c0_12] : memref<8x128xf32, #tpu.memory_space<vmem>>, vector<8x128xf32>
    tpu.vector_store %arg8[%c0_11, %c0_12], %13 {strides = array<i32>} : memref<8x128xf32, #tpu.memory_space<vmem>>, vector<8x128xf32>,
    return
  }
  func.func @transform_0(%arg0: i32, %arg1: i32) -> (i32, i32) {
    %c0_i32 = arith.constant 0 : i32
    %c0_i32_0 = arith.constant 0 : i32
    return %arg0, %c0_i32 : i32, i32
  }
  func.func @transform_1(%arg0: i32, %arg1: i32) -> (i32, i32) {
    %c0_i32 = arith.constant 0 : i32
    %c0_i32_0 = arith.constant 0 : i32
    return %c0_i32, %arg1 : i32, i32
  }
  func.func @transform_2(%arg0: i32, %arg1: i32) -> (i32, i32) {
    %c0_i32 = arith.constant 0 : i32
    %c0_i32_0 = arith.constant 0 : i32
    return %c0_i32, %arg1 : i32, i32
  }
  func.func @transform_3(%arg0: i32, %arg1: i32) -> (i32, i32) {
    %c0_i32 = arith.constant 0 : i32
    %c0_i32_0 = arith.constant 0 : i32
    return %arg1, %c0_i32 : i32, i32
  }
  func.func @transform_4(%arg0: i32, %arg1: i32) -> (i32, i32) {
    %c0_i32 = arith.constant 0 : i32
    %c0_i32_0 = arith.constant 0 : i32
    %c0_i32_1 = arith.constant 0 : i32
    return %c0_i32, %c0_i32_0 : i32, i32
  }
  func.func @transform_5(%arg0: i32, %arg1: i32) -> i32 {
    %c0_i32 = arith.constant 0 : i32
    %c0_i32_0 = arith.constant 0 : i32
    return %c0_i32 : i32
  }
  func.func @transform_6(%arg0: i32, %arg1: i32) -> (i32, i32) {
    %c0_i32 = arith.constant 0 : i32
    %c0_i32_0 = arith.constant 0 : i32
    return %arg0, %c0_i32 : i32, i32
  }
}

</mosaic_0001>

<bundles_post_ra>
// kernel: tpu_custom_call.1
= control target key start
LH: loop header
LB: loop body
LE: loop exit
PB: predicated region body
PF: predicated region fallthrough
CT: control target
= control target key end

     0   :  { %12 = vsyncpa [#allocation4], 0  ;;  %s1367_s0 = inlined_call_operand.hbm [shape: bf16[16,128], index: 0, kind: input, shape index: {}]   ;;  %s1368_s1 = inlined_call_operand.hbm [shape: bf16[128,128], index: 1, kind: input, shape index: {}]   ;;  %s1369_s2 = inlined_call_operand.vmem [shape: f32[1,128], index: 2, kind: input, shape index: {}]   ;;  %s1370_s3 = inlined_call_operand.hbm [shape: bf16[128,128], index: 3, kind: input, shape index: {}]   ;;  %s1371_s4 = inlined_call_operand.vmem [shape: f32[1,128], index: 4, kind: input, shape index: {}]   ;;  %s1372_s5 = inlined_call_operand.<no memory space> [shape: s32[1], index: 5, kind: input, shape index: {}]   ;;  %s1373_s6 = inlined_call_operand.hbm [shape: f32[16,128], index: 6, kind: output, shape index: {}]  }
   0x1   :  { %14 = vsyncpa [#allocation4 + $0x1], 0 }
   0x2   :  { %15 = vsyncpa [#allocation7], 0 }
   0x3   :  { %16 = vsyncpa [#allocation5], 0 }
   0x4   :  { %18 = vsyncpa [#allocation5 + $0x1], 0  ;;  %s1107_s21 = smov 0   ;;  %s1109_s22 = smov 0  }
   0x5   :  { %s1111_s23 = smov 0   ;;  %s1113_s24 = smov 0  }
   0x6   :  { %s1115_s25 = smov 0   ;;  %s1117_s26 = smov 0  }
   0x7 LB: > { %s693_s5 = sadd.s32 4294967295, %s1062_s26   ;;  %s694_s27 = sadd.s32 4294967294, %s1062_s26   ;;  %s1062_s26 = sphi %s1117_s26, %s24_s26   ;;  %s1058_s25 = sphi %s1115_s25, %s1395_s25   ;;  %s1054_s24 = sphi %s1113_s24, %s1394_s24   ;;  %s1050_s23 = sphi %s1111_s23, %s1393_s23   ;;  %s1046_s22 = sphi %s1109_s22, %s1392_s22   ;;  %s1042_s21 = sphi %s1107_s21, %s1391_s21  }
   0x8   : > { %p56_p0 = scmp.ne.s32.totalorder %s1046_s22, %s1042_s21  ;;  %p1141_p1 = scmp.eq.s32.totalorder %s693_s5, 0 }
   0x9   : > { %p1145_p2 = scmp.eq.s32.totalorder %s693_s5, 1  ;;  %p206_p3 = scmp.eq.s32.totalorder %s694_s27, 1 }
   0xa   : > { %s1378_s28 = scalar_select %p1141_p1, 1, 0 }
   0xb   : > { %p1151_p4 = por %p1141_p1, %p56_p0  ;;  %p695_p5 = scmp.ge.s32.totalorder %s1062_s26, 1 }
   0xc   : > { %p1156_p6 = por %p206_p3, %p56_p0  ;;  %p213_p7 = scmp.lt.s32.totalorder %s1062_s26, 3 }
   0xd   : > { %s1380_s30 = scalar_select %p1151_p4, 1, 0 }
   0xe   : > { %s1381_s7 = scalar_select %p1156_p6, 1, 0 }
   0xf   : > { %p1161_p8 = pnand %p695_p5, %p213_p7  ;;  %s1064_s9 = smov [#allocation6]  }
  0x10   : > { %s227_s10 = sshll.u32 %s1064_s9, 4  ;;  %s1065_s12 = smov [#allocation8]   ;;  %s1165_s10 = int_to_ptr.vmem [resolvable:$true] %s227_s10 }
  0x11   : > { %p799_p9 = pneg %p1161_p8  ;;  %s249_s13 = sshll.u32 %s1065_s12, 4  ;;  %s1176_s13 = int_to_ptr.vmem [resolvable:$true] %s249_s13 }
  0x12   : > { %s890_s16 = scalar_lea.hbm %s1368_s1, 1024 }
  0x13   : > { %p1172_p11 = pnand %p799_p9, %p1141_p1  ;;  %p891_p12 = scmp.ne.s32.totalorder %s1368_s1, %s890_s16 }
  0x14   : > { %p897_p5 = scmp.lt.u32.totalorder %s890_s16, %s1368_s1 }
  0x15   : > { %p892_p13 = pneg %p1172_p11 }
  0x17   : > { %p893_p0 = pnand %p892_p13, %p891_p12 }
  0x19   : > { %p894_p3 = pneg %p893_p0 }
  0x1b   : > { %p899_p7 = pnand %p897_p5, %p894_p3 }
  0x1d   : > { %902 = shalt.err (!%p899_p7)
}
  0x1e   : > { %s903_s5 = scalar_lea.vmem %s1165_s10, 1024  ;;  %p911_p1 = scmp.lt.s32.totalorder %s1165_s10, %s1165_s10 }
  0x1f   : > { %p904_p9 = scmp.ne.s32.totalorder %s1165_s10, %s903_s5  ;;  %p912_p12 = scmp.lt.s32.totalorder %s903_s5, %s903_s5 }
  0x21   : > { %p906_p10 = pnand %p904_p9, %p892_p13  ;;  %p913_p0 = por %p912_p12, %p911_p1 }
  0x23   : > { %p907_p6 = pneg %p906_p10 }
  0x25   : > { %p914_p4 = pnand %p913_p0, %p907_p6 }
  0x27   : > { %917 = shalt.err (!%p914_p4)
}
  0x28   : > { %s1066_s27 = smov 64   ;;  %s1067_s9 = smov 4  }
  0x29   : > { %802 = dma.hbm_to_vmem [thread:$0]  (!%p1172_p11), %s1368_s1, 1024, %s1165_s10, [#allocation7], %s1066_s27, %s1066_s27, %s1067_s9  }
  0x2a   : > { %s918_s17 = scalar_lea.hbm %s1370_s3, 1024 }
  0x2b   : > { %p919_p1 = scmp.ne.s32.totalorder %s1370_s3, %s918_s17  ;;  %p925_p10 = scmp.lt.u32.totalorder %s918_s17, %s1370_s3 }
  0x2d   : > { %p921_p4 = pnand %p919_p1, %p892_p13 }
  0x2f   : > { %p922_p6 = pneg %p921_p4 }
  0x31   : > { %p927_p3 = pnand %p925_p10, %p922_p6 }
  0x33   : > { %930 = shalt.err (!%p927_p3)
}
  0x34   : > { %s931_s10 = scalar_lea.vmem %s1176_s13, 1024  ;;  %p939_p12 = scmp.lt.s32.totalorder %s1176_s13, %s1176_s13 }
  0x35   : > { %p932_p5 = scmp.ne.s32.totalorder %s1176_s13, %s931_s10  ;;  %p940_p0 = scmp.lt.s32.totalorder %s931_s10, %s931_s10 }
  0x37   : > { %p934_p7 = pnand %p932_p5, %p892_p13  ;;  %p941_p1 = por %p940_p0, %p939_p12 }
  0x39   : > { %p935_p9 = pneg %p934_p7 }
  0x3b   : > { %p942_p4 = pnand %p941_p1, %p935_p9 }
  0x3d   : > { %945 = shalt.err (!%p942_p4)
}
  0x3e   : > { %805 = dma.hbm_to_vmem [thread:$0]  (!%p1172_p11), %s1370_s3, 1024, %s1176_s13, [#allocation7], %s1066_s27, %s1066_s27, %s1067_s9  }
  0x3f   : > { %s36_s15 = sadd.s32 1, %s1058_s25  ;;  %s43_s16 = sadd.s32 1, %s1050_s23 }
  0x40   : > { %p38_p13 = scmp.ge.s32.totalorder %s36_s15, 2  ;;  %p50_p6 = scmp.ne.s32.totalorder %s1050_s23, %s1046_s22 }
  0x41   : > { %p51_p10 = scmp.eq.s32.totalorder %s1062_s26, 0  ;;  %p816_p3 = scmp.lt.s32.totalorder %s1062_s26, 2 }
  0x42   : > { %s1397_s15 = smov (%p38_p13, %s36_s15), 0  ;;  %p1240_p7 = por %p1145_p2, %p50_p6 }
  0x43   : > { %p52_p5 = por %p51_p10, %p50_p6  ;;  %s40_s17 = ssub.s32 %s1058_s25, %s1397_s15 }
  0x44   : > { %s1384_s11 = scalar_select %p1240_p7, 1, 0 }
  0x45   : > { %s269_s18 = sand.u32 1, %s1050_s23   ;;  %p41_p9 = scmp.eq.s32.totalorder %s40_s17, 0 }
  0x46   : > { %s700_s13 = sshll.u32 %s269_s18, 2  ;;  %s701_s27 = sshll.u32 %s1058_s25, 6 }
  0x47   : > { %s1249_s9 = scalar_select %p41_p9, %s1050_s23, %s43_s16  }
  0x48   : > { %s1254_s5 = scalar_lea.hbm %s1367_s0, %s701_s27  ;;  %s273_s29 = scalar_lea.vmem [#allocation3], %s700_s13 }
  0x49   : > { %s280_s10 = sshll.u32 %s273_s29, 4  ;;  %p1258_p2 = pnand %p816_p3, %p52_p5  ;;  %s1262_s10 = int_to_ptr.vmem [resolvable:$true] %s280_s10 }
  0x4a   : > { %s270_s14 = scalar_lea.sflag [#allocation4], %s269_s18  ;;  %s946_s16 = scalar_lea.hbm %s1254_s5, 64 }
  0x4b   : > { %p947_p11 = scmp.ne.s32.totalorder %s1254_s5, %s946_s16  ;;  %p948_p12 = pneg %p1258_p2 }
  0x4c   : > { %s951_s27 = scalar_lea.hbm %s1367_s0, 128  ;;  %p952_p4 = scmp.lt.u32.totalorder %s1254_s5, %s1367_s0 }
  0x4d   : > { %p949_p0 = pnand %p948_p12, %p947_p11  ;;  %p953_p13 = scmp.lt.u32.totalorder %s951_s27, %s946_s16 }
  0x4e   : > { %p955_p10 = scmp.lt.u32.totalorder %s946_s16, %s1254_s5 }
  0x4f   : > { %p950_p1 = pneg %p949_p0  ;;  %p954_p6 = por %p953_p13, %p952_p4 }
  0x51   : > { %p956_p3 = por %p955_p10, %p954_p6 }
  0x53   : > { %p957_p5 = pnand %p956_p3, %p950_p1 }
  0x55   : > { %960 = shalt.err (!%p957_p5)
}
  0x56   : > { %s961_s18 = scalar_lea.vmem %s1262_s10, 64  ;;  %s1068_s29 = smov [#allocation3]  }
  0x57   : > { %p962_p9 = scmp.ne.s32.totalorder %s1262_s10, %s961_s18  ;;  %s966_s17 = sshll.u32 %s1068_s29, 4  ;;  %s967_s17 = int_to_ptr.vmem [resolvable:$false] %s966_s17 }
  0x58   : > { %s968_s13 = scalar_lea.vmem %s967_s17, 128  ;;  %p969_p7 = scmp.lt.s32.totalorder %s1262_s10, %s967_s17 }
  0x59   : > { %p964_p11 = pnand %p962_p9, %p948_p12  ;;  %p970_p4 = scmp.lt.s32.totalorder %s968_s13, %s961_s18 }
  0x5b   : > { %p965_p0 = pneg %p964_p11  ;;  %p971_p13 = por %p970_p4, %p969_p7 }
  0x5d   : > { %p972_p6 = pnand %p971_p13, %p965_p0 }
  0x5f   : > { %975 = shalt.err (!%p972_p6)
}
  0x60   : > { %809 = dma.hbm_to_vmem [thread:$0]  (!%p1258_p2), %s1254_s5, 64, %s1262_s10, %s270_s14  }
  0x61   : > { %289 = sbr.rel (%p1161_p8) target bundleno = 588 (0x24c), region = 44  ;;  %s1292_s16 = sand.u32 (!%p1161_p8), 1, %s1046_s22  }
  0x62   : > { %s703_s27 = sshll.u32 (!%p1161_p8), %s1292_s16, 2  ;;  %s292_s19 = scalar_lea.sflag (!%p1161_p8), [#allocation4], %s1292_s16 }
  0x63   : > { %s1296_s20 = scalar_lea.vmem (!%p1161_p8), [#allocation3], %s703_s27  ;;  %p1386_p7 = scmp.ne.s32.totalorder (!%p1161_p8), %s1380_s30, 0 }
  0x68   : > { %1029 = dma.done.wait (%p1386_p7), %s292_s19, 64  }
  0x69   : > { %1031 = vsyncadd (%p1386_p7), %s292_s19, 4294967232  ;;  %p1387_p2 = scmp.ne.s32.totalorder %s1378_s28, 0 }
  0x6b   : > { %1033 = dma.done.wait (%p1387_p2), [#allocation7], 2048  }
  0x6c   : > { %1035 = vsyncadd (%p1387_p2), [#allocation7], 4294965248  ;;  %v1069_v0 = vmov 0.0   ;;  %vm1070_vm0 = vmmov 0   ;;  %v874_v1 = vld [vmem:[#allocation6] sm:$0xff]   ;;  %v875_v2 = vld [vmem:[#allocation6 + $0x8] sm:$0xff]  }
  0x6d   : > { %747 = vmatprep.subr.bf16.mxu0 %v1069_v0  ;;  %763 = vmatprep.mubr.msk.bf16.mxu0 %vm1070_vm0, %v1069_v0  ;;  %v876_v3 = vld [vmem:[#allocation6 + $0x10] sm:$0xff]   ;;  %v882_v4 = vld [vmem:[#allocation8] sm:$0xff]   ;;  %v877_v5 = vld [vmem:[#allocation6 + $0x18] sm:$0xff]   ;;  %s706_s8 = sshll.u32 %s1292_s16, 3  ;;  %s726_s12 = sshll.u32 %s1054_s24, 7 }
  0x6e   : > { %767 = vmatprep.subr.bf16.mxu1 %v1069_v0  ;;  %783 = vmatprep.mubr.msk.bf16.mxu1 %vm1070_vm0, %v1069_v0  ;;  %v883_v6 = vld [vmem:[#allocation8 + $0x8] sm:$0xff]   ;;  %v878_v7 = vld [vmem:[#allocation6 + $0x20] sm:$0xff]   ;;  %v884_v8 = vld [vmem:[#allocation8 + $0x10] sm:$0xff]   ;;  %s334_s14 = scalar_lea.vmem [#allocation9], %s706_s8  ;;  %s1318_s13 = scalar_lea.hbm %s1373_s6, %s726_s12 }
  0x6f   : > { %748 = vmatpush3.bf16.msra.mxu0 %v874_v1  ;;  %768 = vmatpush3.bf16.msra.mxu1 %v882_v4  ;;  %v879_v9 = vld [vmem:[#allocation6 + $0x28] sm:$0xff]   ;;  %v885_v10 = vld [vmem:[#allocation8 + $0x18] sm:$0xff]   ;;  %v880_v11 = vld [vmem:[#allocation6 + $0x30] sm:$0xff]   ;;  %s580_s18 = sshll.u32 %s334_s14, 4  ;;  %s567_s27 = scalar_lea.sflag [#allocation5], %s1292_s16  ;;  %s1320_s18 = int_to_ptr.vmem [resolvable:$true] %s580_s18 }
  0x70   : > { %749 = vmatprep.subr.bf16.mxu0 %v1069_v0  ;;  %769 = vmatprep.subr.bf16.mxu1 %v1069_v0  ;;  %v886_v12 = vld [vmem:[#allocation8 + $0x20] sm:$0xff]   ;;  %v881_v13 = vld [vmem:[#allocation6 + $0x38] sm:$0xff]   ;;  %v887_v14 = vld [vmem:[#allocation8 + $0x28] sm:$0xff]   ;;  %s976_s24 = scalar_lea.vmem %s1320_s18, 128  ;;  %p1388_p12 = scmp.ne.s32.totalorder %s1384_s11, 0 }
  0x71   : > { %v340_v15 = vld [vmem:[%s1296_s20] sm:$0xf]  ;;  %v888_v16 = vld [vmem:[#allocation8 + $0x30] sm:$0xff]   ;;  %p977_p8 = scmp.ne.s32.totalorder %s1320_s18, %s976_s24  ;;  %s1071_s19 = smov [#allocation9]  }
  0x72   : > { %v889_v17 = vld [vmem:[#allocation8 + $0x38] sm:$0xff]   ;;  %s980_s20 = sshll.u32 %s1071_s19, 4  ;;  %s981_s20 = int_to_ptr.vmem [resolvable:$false] %s980_s20 }
  0x73   : > { %750 = vmatpush3.bf16.msra.mxu0 %v875_v2  ;;  %770 = vmatpush3.bf16.msra.mxu1 %v883_v6  ;;  %v707_v18 = vld [vmem:[%s1369_s2] ss:$0 sm:$0xff]  ;;  %p978_p1 = pnand %p977_p8, %p1388_p12  ;;  %s982_s28 = scalar_lea.vmem %s981_s20, 256 }
  0x74   : > { %751 = vmatprep.subr.bf16.mxu0 %v1069_v0  ;;  %771 = vmatprep.subr.bf16.mxu1 %v1069_v0  ;;  %v716_v26 = vld [vmem:[%s1371_s4] ss:$0 sm:$0xff]  ;;  %p983_p3 = scmp.lt.s32.totalorder %s1320_s18, %s981_s20  ;;  %p984_p5 = scmp.lt.s32.totalorder %s982_s28, %s976_s24 }
  0x75   : > { %p979_p10 = pneg %p978_p1 }
  0x76   : > { %p985_p9 = por %p984_p5, %p983_p3 }
  0x77   : > { %752 = vmatpush3.bf16.msra.mxu0 %v876_v3  ;;  %772 = vmatpush3.bf16.msra.mxu1 %v884_v8 }
  0x78   : > { %753 = vmatprep.subr.bf16.mxu0 %v1069_v0  ;;  %773 = vmatprep.subr.bf16.mxu1 %v1069_v0  ;;  %p986_p11 = pnand %p985_p9, %p979_p10 }
  0x7b   : > { %754 = vmatpush3.bf16.msra.mxu0 %v877_v5  ;;  %774 = vmatpush3.bf16.msra.mxu1 %v885_v10 }
  0x7c   : > { %755 = vmatprep.subr.bf16.mxu0 %v1069_v0  ;;  %775 = vmatprep.subr.bf16.mxu1 %v1069_v0 }
  0x7f   : > { %756 = vmatpush3.bf16.msra.mxu0 %v878_v7  ;;  %776 = vmatpush3.bf16.msra.mxu1 %v886_v12 }
  0x80   : > { %757 = vmatprep.subr.bf16.mxu0 %v1069_v0  ;;  %777 = vmatprep.subr.bf16.mxu1 %v1069_v0 }
  0x83   : > { %758 = vmatpush3.bf16.msra.mxu0 %v879_v9  ;;  %778 = vmatpush3.bf16.msra.mxu1 %v887_v14 }
  0x84   : > { %759 = vmatprep.subr.bf16.mxu0 %v1069_v0  ;;  %779 = vmatprep.subr.bf16.mxu1 %v1069_v0 }
  0x87   : > { %760 = vmatpush3.bf16.msra.mxu0 %v880_v11  ;;  %780 = vmatpush3.bf16.msra.mxu1 %v888_v16 }
  0x88   : > { %761 = vmatprep.subr.bf16.mxu0 %v1069_v0  ;;  %781 = vmatprep.subr.bf16.mxu1 %v1069_v0 }
  0x8b   : > { %762 = vmatpush3.bf16.msra.mxu0 %v881_v13  ;;  %782 = vmatpush3.bf16.msra.mxu1 %v889_v17 }
  0x8e   : > { %764 = vmatmul.mubr.bf16.vlgmr.msra.gmra.mrb[0].mxu0 %v340_v15 }
 0x161   : > { %v446_v19 = vpop.f32.mrb[0].mxu0 }
 0x162   : > { %v447_v20 = vadd.f32 %v707_v18, %v446_v19  ;;  %v765_v21 = vpop.f32.mrb[1].mxu0 }
 0x163   : > { %v449_v22 = vpop.f32.mrb[2].mxu0 }
 0x164   : > { %v452_v23 = vmax.f32 %v447_v20, 0.0  ;;  %v766_v24 = vpop.f32.mrb[3].mxu0 }
 0x166   : > { %v453_v25 = vpack.c.bf16 %v452_v23, %v452_v23 }
 0x168   : > { %784 = vmatmul.mubr.bf16.vlgmr.msra.gmra.mrb[0].mxu1 %v453_v25 }
 0x23b   : > { %v559_v27 = vpop.f32.mrb[0].mxu1 }
 0x23c   : > { %v560_v28 = vadd.f32 %v716_v26, %v559_v27  ;;  %v785_v29 = vpop.f32.mrb[1].mxu1 }
 0x23d   : > { %v562_v30 = vpop.f32.mrb[2].mxu1 }
 0x23e   : > { %565 = vst [vmem:[%s334_s14] sm:$0xff] %v560_v28  ;;  %v786_v31 = vpop.f32.mrb[3].mxu1 }
 0x23f   : > { %989 = shalt.err (!%p986_p11)
}
 0x240   : > { %s990_s16 = scalar_lea.hbm %s1318_s13, 128  ;;  %s994_s5 = scalar_lea.hbm %s1373_s6, 256 }
 0x241   : > { %p991_p0 = scmp.ne.s32.totalorder %s1318_s13, %s990_s16  ;;  %p995_p6 = scmp.lt.u32.totalorder %s1318_s13, %s1373_s6 }
 0x242   : > { %p996_p7 = scmp.lt.u32.totalorder %s994_s5, %s990_s16  ;;  %p998_p8 = scmp.lt.u32.totalorder %s990_s16, %s1318_s13 }
 0x243   : > { %p992_p4 = pnand %p991_p0, %p1388_p12 }
 0x244   : > { %p997_p2 = por %p996_p7, %p995_p6 }
 0x245   : > { %p993_p13 = pneg %p992_p4 }
 0x246   : > { %p999_p1 = por %p998_p8, %p997_p2 }
 0x248   : > { %p1000_p10 = pnand %p999_p1, %p993_p13 }
 0x24a   : > { %1003 = shalt.err (!%p1000_p10)
}
 0x24b   : > { %797 = dma.vmem_to_hbm [thread:$0]  (%p1388_p12), %s1320_s18, 128, %s1318_s13, %s567_s27  }
 0x24c PF: > { %s592_s14 = sand.u32 1, %s1042_s21   ;;  %p1389_p3 = scmp.ne.s32.totalorder %s1381_s7, 0 }
 0x24d   : > { %p1390_p5 = scmp.ge.s32.totalorder %s1062_s26, 2  ;;  %s593_s29 = scalar_lea.sflag [#allocation5], %s592_s14 }
 0x24f   : > { %p811_p9 = pnand %p1390_p5, %p1389_p3 }
 0x251   : > { %1037 = dma.done.wait (!%p811_p9), %s593_s29, 128  }
 0x252   : > { %1039 = vsyncadd (!%p811_p9), %s593_s29, 4294967168  ;;  %s24_s26 = sadd.s32 1, %s1062_s26   ;;  %s1391_s21 = smov %s1046_s22 }
 0x253   : > { %p21_p11 = scmp.ge.s32.totalorder %s24_s26, 4   ;;  %s1392_s22 = smov %s1050_s23 }
 0x254   : > { %s1393_s23 = smov %s1249_s9  ;;  %s1394_s24 = smov %s1058_s25 }
 0x255   : > { %s1395_s25 = smov %s1397_s15  ;;  %23 = sbr.rel (!%p21_p11) target bundleno = 7 (0x7), region = 102 }
 0x25c   :  { %598 = vsyncpa [#allocation4], 1 }
 0x25d   :  { %600 = vsyncpa [#allocation4 + $0x1], 1 }
 0x25e   :  { %601 = vsyncpa [#allocation7], 1 }
 0x25f   :  { %602 = vsyncpa [#allocation5], 1 }
 0x260   :  { %604 = vsyncpa [#allocation5 + $0x1], 1 }

</bundles_post_ra>
